<compile_context>
chip_gen: v7x
topology: tpu7x:2x2x1
jax: 0.10.0
libtpu: 0.0.40
codegen_flags: <defaults>
</compile_context>

<pallas_src>
import jax
import jax.numpy as jnp
from jax.experimental import pallas as pl
from jax.experimental.pallas import tpu as pltpu

EPS = 1e-5


# ---------------------------------------------------------------------------
# Fused Pallas kernel: conv3x3 -> channel attention -> BN -> ReLU (Nb images)
# ---------------------------------------------------------------------------

def _make_scab_kernel(Nb, HW):
    inv_hw = 1.0 / float(HW)

    def kernel(x_ref, w_ref, w1t_ref, w2t_ref, b_ref, s_ref, t_ref,
               o_ref, att_ref, conv_scr, pool_scr):
        # ---- conv3x3 as ONE K=9*Cin matmul per image, channels-first output -----
        for i in range(Nb):
            conv = jnp.dot(w_ref[...], x_ref[i],
                           preferred_element_type=jnp.float32)        # (Cout, HW)
            conv_scr[i] = conv
            # pooling on the exact H*W grid (no mask); +b correction added below
            pool_scr[:, i:i + 1] = jnp.sum(conv, axis=1, keepdims=True) * inv_hw
            pool_scr[:, Nb + i:Nb + i + 1] = jnp.max(conv, axis=1, keepdims=True)

        # ---- channel attention: batched shared MLP over all 2*Nb pooled vectors --
        pooled = pool_scr[...] + b_ref[...]                            # (Cout, 2*Nb)
        hid = jnp.maximum(
            jnp.dot(w1t_ref[...], pooled, preferred_element_type=jnp.float32), 0.0)
        mlp = jnp.dot(w2t_ref[...], hid, preferred_element_type=jnp.float32)
        att = jax.nn.sigmoid(mlp[:, :Nb] + mlp[:, Nb:])                # (Cout, Nb)
        att_ref[...] = att

        # ---- (conv + b) * att -> BN -> ReLU with bias/BN folded to scale/shift ---
        scale = att * s_ref[...]                                       # (Cout, Nb)
        shift = b_ref[...] * scale + t_ref[...]                        # (Cout, Nb)
        for i in range(Nb):
            o_ref[i] = jnp.maximum(
                conv_scr[i] * scale[:, i:i + 1] + shift[:, i:i + 1], 0.0)

    return kernel


def _scab_pallas(im2col, wT, w1t, w2t, b, bn_s, bn_t, *, Nb, HW):
    N, K, _ = im2col.shape
    Cout = wT.shape[0]
    hidden = w1t.shape[0]
    nblk = N // Nb

    out, att = pl.pallas_call(
        _make_scab_kernel(Nb, HW),
        out_shape=(jax.ShapeDtypeStruct((N, Cout, HW), jnp.float32),
                   jax.ShapeDtypeStruct((nblk, Cout, Nb), jnp.float32)),
        grid_spec=pltpu.PrefetchScalarGridSpec(
            num_scalar_prefetch=0,
            grid=(nblk,),
            in_specs=[
                pl.BlockSpec((Nb, K, HW), lambda n: (n, 0, 0)),
                pl.BlockSpec((Cout, K), lambda n: (0, 0)),
                pl.BlockSpec((hidden, Cout), lambda n: (0, 0)),
                pl.BlockSpec((Cout, hidden), lambda n: (0, 0)),
                pl.BlockSpec((Cout, 1), lambda n: (0, 0)),
                pl.BlockSpec((Cout, 1), lambda n: (0, 0)),
                pl.BlockSpec((Cout, 1), lambda n: (0, 0)),
            ],
            out_specs=[
                pl.BlockSpec((Nb, Cout, HW), lambda n: (n, 0, 0)),
                pl.BlockSpec((None, Cout, Nb), lambda n: (n, 0, 0)),
            ],
            scratch_shapes=[pltpu.VMEM((Nb, Cout, HW), jnp.float32),
                            pltpu.VMEM((Cout, 2 * Nb), jnp.float32)],
        ),
        compiler_params=pltpu.CompilerParams(
            dimension_semantics=("parallel",)),   # v7x: split batch blocks over TCs
    )(im2col, wT, w1t, w2t, b, bn_s, bn_t)
    return out, att


# ---------------------------------------------------------------------------
# Forward wrapper (NCHW boundary, matches the PyTorch module)
# ---------------------------------------------------------------------------

def _pick_block_batch(N, cap=8):
    # Largest divisor of N (<= cap) that still leaves >= 2 grid steps (so v7x's
    # two TensorCores both get work); amortizes per-step overhead for large N.
    best = 1
    for nb in range(1, min(N, cap) + 1):
        if N % nb == 0 and (N // nb >= 2 or N == 1):
            best = nb
    return best


def single_channel_attention_block(params, x_nchw):
    """Forward of SingleChannelAttentionBlock. x: (N, Cin, H, W) float32."""
    N, Cin, H, W = x_nchw.shape
    Cout = params["w"].shape[0]
    HW = H * W
    Nb = _pick_block_batch(N)

    # im2col built channels-first directly from NCHW: K index = c*9 + 3*dy + dx,
    # matching params["w"].reshape(Cout, Cin*9). Exact H*W output grid.
    xpad = jnp.pad(x_nchw, ((0, 0), (0, 0), (1, 1), (1, 1)))
    taps = [xpad[:, :, dy:dy + H, dx:dx + W].reshape(N, Cin, 1, HW)
            for dy in range(3) for dx in range(3)]
    im2col = jnp.concatenate(taps, axis=2).reshape(N, Cin * 9, HW)

    wT = params["w"].reshape(Cout, Cin * 9)
    w1t = params["w1"].T                       # (hidden, Cout)
    w2t = params["w2"].T                       # (Cout, hidden)
    b = params["b"].reshape(Cout, 1)
    bn_s = params["bn_s"].reshape(Cout, 1)
    bn_t = params["bn_t"].reshape(Cout, 1)

    out, att = _scab_pallas(im2col, wT, w1t, w2t, b, bn_s, bn_t, Nb=Nb, HW=HW)

    out = out.reshape(N, Cout, H, W)                            # already NCHW
    att = jnp.transpose(att, (0, 2, 1)).reshape(N, Cout, 1, 1)  # tiny
    return out, {"att": att}


# ---------------------------------------------------------------------------
# Deterministic parameter init (shapes follow the PyTorch module __init__)
# ---------------------------------------------------------------------------

def init_params(key, in_channels, out_channels):
    kw, kb, k1, k2, kbn = jax.random.split(key, 5)
    bound = 1.0 / jnp.sqrt(jnp.float32(in_channels * 9))
    w = jax.random.uniform(kw, (out_channels, in_channels, 3, 3), jnp.float32,
                           -bound, bound)
    b = jax.random.uniform(kb, (out_channels,), jnp.float32, -bound, bound)

    # TODO(synk): ChannelAttention definition is not in the provided source; using a
    # CBAM-style shared MLP (hidden = max(1, C//4), no bias, avg+max pooling).
    hidden = max(1, out_channels // 4)
    b1 = 1.0 / jnp.sqrt(jnp.float32(out_channels))
    b2 = 1.0 / jnp.sqrt(jnp.float32(hidden))
    w1 = jax.random.uniform(k1, (out_channels, hidden), jnp.float32, -b1, b1)
    w2 = jax.random.uniform(k2, (hidden, out_channels), jnp.float32, -b2, b2)

    kg, kbeta, km, kv = jax.random.split(kbn, 4)
    gamma = jax.random.uniform(kg, (out_channels,), jnp.float32, 0.5, 1.5)
    beta = jax.random.uniform(kbeta, (out_channels,), jnp.float32, -0.1, 0.1)
    mean = jax.random.uniform(km, (out_channels,), jnp.float32, -0.1, 0.1)
    var = jax.random.uniform(kv, (out_channels,), jnp.float32, 0.5, 1.5)
    bn_s = gamma / jnp.sqrt(var + EPS)
    bn_t = beta - mean * bn_s
    return {"w": w, "b": b, "w1": w1, "w2": w2, "bn_s": bn_s, "bn_t": bn_t}


# ---------------------------------------------------------------------------
# Pure-JAX reference (same math) for a correctness check
# ---------------------------------------------------------------------------

def reference_forward(params, x_nchw):
    conv = jax.lax.conv_general_dilated(
        x_nchw, params["w"], window_strides=(1, 1), padding=((1, 1), (1, 1)),
        dimension_numbers=("NCHW", "OIHW", "NCHW"),
        precision=jax.lax.Precision.HIGHEST)
    conv = conv + params["b"][None, :, None, None]
    avg = jnp.mean(conv, axis=(2, 3))
    mx = jnp.max(conv, axis=(2, 3))

    def mlp(v):
        return jnp.maximum(v @ params["w1"], 0.0) @ params["w2"]

    att = jax.nn.sigmoid(mlp(avg) + mlp(mx))
    y = conv * att[:, :, None, None]
    out = jnp.maximum(y * params["bn_s"][None, :, None, None]
                      + params["bn_t"][None, :, None, None], 0.0)
    return out, att[:, :, None, None]


if __name__ == "__main__":
    key = jax.random.PRNGKey(0)
    kp, kx = jax.random.split(key)

    in_channels, out_channels, H, W, N = 4, 32, 16, 16, 2
    params = init_params(kp, in_channels, out_channels)
    x = jax.random.normal(kx, (N, in_channels, H, W), jnp.float32)

    fwd = jax.jit(single_channel_attention_block)
    out, aux = fwd(params, x)
    jax.block_until_ready((out, aux))

    assert out.shape == (N, out_channels, H, W)
    assert aux["att"].shape == (N, out_channels, 1, 1)

    ref_out, ref_att = reference_forward(params, x)
    assert jnp.allclose(out, ref_out, atol=2e-2, rtol=2e-2), \
        float(jnp.max(jnp.abs(out - ref_out)))
    assert jnp.allclose(aux["att"], ref_att, atol=2e-2, rtol=2e-2), \
        float(jnp.max(jnp.abs(aux["att"] - ref_att)))

    print("KERNEL_OK")
</pallas_src>

<mosaic_0001>
module attributes {stable_mosaic.version = 11 : i64} {
  func.func @kernel(%arg0: i32, %arg1: memref<1x36x256xf32, #tpu.memory_space<vmem>>, %arg2: memref<32x36xf32, #tpu.memory_space<vmem>>, %arg3: memref<8x32xf32, #tpu.memory_space<vmem>>, %arg4: memref<32x8xf32, #tpu.memory_space<vmem>>, %arg5: memref<32x1xf32, #tpu.memory_space<vmem>>, %arg6: memref<32x1xf32, #tpu.memory_space<vmem>>, %arg7: memref<32x1xf32, #tpu.memory_space<vmem>>, %arg8: memref<1x32x256xf32, #tpu.memory_space<vmem>>, %arg9: memref<1x32x1xf32, #tpu.memory_space<vmem>>, %arg10: memref<1x32x256xf32, #tpu.memory_space<vmem>>, %arg11: memref<32x2xf32, #tpu.memory_space<vmem>>) attributes {dimension_semantics = [#tpu.dimension_semantics<parallel>], iteration_bounds = array<i64: 2>, scalar_prefetch = 0 : i64, scratch_operands = 2 : i64, tpu.core_type = #tpu.core_type<tc>, window_params = [{transform_indices = @transform_0, window_bounds = array<i64: 1, 36, 256>}, {pipeline_mode = #tpu.pipeline_mode<synchronous>, transform_indices = @transform_1, window_bounds = array<i64: 32, 36>}, {pipeline_mode = #tpu.pipeline_mode<synchronous>, transform_indices = @transform_2, window_bounds = array<i64: 8, 32>}, {pipeline_mode = #tpu.pipeline_mode<synchronous>, transform_indices = @transform_3, window_bounds = array<i64: 32, 8>}, {pipeline_mode = #tpu.pipeline_mode<synchronous>, transform_indices = @transform_4, window_bounds = array<i64: 32, 1>}, {pipeline_mode = #tpu.pipeline_mode<synchronous>, transform_indices = @transform_5, window_bounds = array<i64: 32, 1>}, {pipeline_mode = #tpu.pipeline_mode<synchronous>, transform_indices = @transform_6, window_bounds = array<i64: 32, 1>}, {transform_indices = @transform_7, window_bounds = array<i64: 1, 32, 256>}, {transform_indices = @transform_8, window_bounds = array<i64: 1, 32, 1>}]} {
    %c0 = arith.constant 0 : index
    %c0_0 = arith.constant 0 : index
    %0 = vector.load %arg2[%c0, %c0_0] : memref<32x36xf32, #tpu.memory_space<vmem>>, vector<32x36xf32>
    %c0_1 = arith.constant 0 : index
    %c0_2 = arith.constant 0 : index
    %c0_3 = arith.constant 0 : index
    %1 = vector.load %arg1[%c0_1, %c0_2, %c0_3] : memref<1x36x256xf32, #tpu.memory_space<vmem>>, vector<1x36x256xf32>
    %2 = vector.shape_cast %1 : vector<1x36x256xf32> to vector<36x256xf32>
    %cst = arith.constant dense<0.000000e+00> : vector<32x256xf32>
    %3 = tpu.matmul %0, %2, %cst {dimension_numbers = #tpu.dot_dimension_numbers<[1], [0], [0], [1], [0, 0, 1, 1], [], []>} : vector<32x36xf32>, vector<36x256xf32>, vector<32x256xf32> -> vector<32x256xf32>
    %c0_4 = arith.constant 0 : index
    %c0_5 = arith.constant 0 : index
    %c0_6 = arith.constant 0 : index
    %4 = vector.load %arg10[%c0_4, %c0_5, %c0_6] : memref<1x32x256xf32, #tpu.memory_space<vmem>>, vector<1x32x256xf32>
    %5 = vector.shape_cast %4 : vector<1x32x256xf32> to vector<32x256xf32>
    %6 = vector.shape_cast %3 : vector<32x256xf32> to vector<1x32x256xf32>
    tpu.vector_store %arg10[%c0_4, %c0_5, %c0_6], %6 {strides = array<i32>} : memref<1x32x256xf32, #tpu.memory_space<vmem>>, vector<1x32x256xf32>,
    %cst_7 = arith.constant dense<0.000000e+00> : vector<32xf32>
    %7 = vector.multi_reduction <add>, %3, %cst_7 [1] : vector<32x256xf32> to vector<32xf32>
    %8 = vector.shape_cast %7 : vector<32xf32> to vector<32x1xf32>
    %cst_8 = arith.constant 3.906250e-03 : f32
    %9 = vector.broadcast %cst_8 : f32 to vector<32x1xf32>
    %10 = arith.mulf %8, %9 : vector<32x1xf32>
    %c0_9 = arith.constant 0 : index
    %c0_10 = arith.constant 0 : index
    %11 = vector.load %arg11[%c0_9, %c0_10] : memref<32x2xf32, #tpu.memory_space<vmem>>, vector<32x1xf32>
    tpu.vector_store %arg11[%c0_9, %c0_10], %10 {strides = array<i32>} : memref<32x2xf32, #tpu.memory_space<vmem>>, vector<32x1xf32>,
    %cst_11 = arith.constant dense<0xFF800000> : vector<32xf32>
    %12 = vector.multi_reduction <maximumf>, %3, %cst_11 [1] : vector<32x256xf32> to vector<32xf32>
    %13 = vector.shape_cast %12 : vector<32xf32> to vector<32x1xf32>
    %c0_12 = arith.constant 0 : index
    %c1 = arith.constant 1 : index
    %14 = vector.load %arg11[%c0_12, %c1] : memref<32x2xf32, #tpu.memory_space<vmem>>, vector<32x1xf32>
    tpu.vector_store %arg11[%c0_12, %c1], %13 {strides = array<i32>} : memref<32x2xf32, #tpu.memory_space<vmem>>, vector<32x1xf32>,
    %c0_13 = arith.constant 0 : index
    %c0_14 = arith.constant 0 : index
    %15 = vector.load %arg11[%c0_13, %c0_14] : memref<32x2xf32, #tpu.memory_space<vmem>>, vector<32x2xf32>
    %c0_15 = arith.constant 0 : index
    %c0_16 = arith.constant 0 : index
    %16 = vector.load %arg5[%c0_15, %c0_16] : memref<32x1xf32, #tpu.memory_space<vmem>>, vector<32x1xf32>
    %17 = vector.broadcast %16 : vector<32x1xf32> to vector<32x2xf32>
    %18 = arith.addf %15, %17 : vector<32x2xf32>
    %c0_17 = arith.constant 0 : index
    %c0_18 = arith.constant 0 : index
    %19 = vector.load %arg3[%c0_17, %c0_18] : memref<8x32xf32, #tpu.memory_space<vmem>>, vector<8x32xf32>
    %cst_19 = arith.constant dense<0.000000e+00> : vector<8x2xf32>
    %20 = tpu.matmul %19, %18, %cst_19 {dimension_numbers = #tpu.dot_dimension_numbers<[1], [0], [0], [1], [0, 0, 1, 1], [], []>} : vector<8x32xf32>, vector<32x2xf32>, vector<8x2xf32> -> vector<8x2xf32>
    %cst_20 = arith.constant 0.000000e+00 : f32
    %21 = vector.broadcast %cst_20 : f32 to vector<8x2xf32>
    %22 = arith.maximumf %20, %21 : vector<8x2xf32>
    %c0_21 = arith.constant 0 : index
    %c0_22 = arith.constant 0 : index
    %23 = vector.load %arg4[%c0_21, %c0_22] : memref<32x8xf32, #tpu.memory_space<vmem>>, vector<32x8xf32>
    %cst_23 = arith.constant dense<0.000000e+00> : vector<32x2xf32>
    %24 = tpu.matmul %23, %22, %cst_23 {dimension_numbers = #tpu.dot_dimension_numbers<[1], [0], [0], [1], [0, 0, 1, 1], [], []>} : vector<32x8xf32>, vector<8x2xf32>, vector<32x2xf32> -> vector<32x2xf32>
    %25 = vector.extract_strided_slice %24 {offsets = [0, 0], sizes = [32, 1], strides = [1, 1]} : vector<32x2xf32> to vector<32x1xf32>
    %26 = vector.extract_strided_slice %24 {offsets = [0, 1], sizes = [32, 1], strides = [1, 1]} : vector<32x2xf32> to vector<32x1xf32>
    %27 = arith.addf %25, %26 : vector<32x1xf32>
    %28 = arith.negf %27 : vector<32x1xf32>
    %29 = math.exp %28 : vector<32x1xf32>
    %cst_24 = arith.constant 1.000000e+00 : f32
    %30 = vector.broadcast %cst_24 : f32 to vector<32x1xf32>
    %31 = arith.addf %30, %29 : vector<32x1xf32>
    %32 = arith.divf %30, %31 : vector<32x1xf32>
    %c0_25 = arith.constant 0 : index
    %c0_26 = arith.constant 0 : index
    %c0_27 = arith.constant 0 : index
    %33 = vector.load %arg9[%c0_25, %c0_26, %c0_27] : memref<1x32x1xf32, #tpu.memory_space<vmem>>, vector<1x32x1xf32>
    %34 = vector.shape_cast %33 : vector<1x32x1xf32> to vector<32x1xf32>
    %35 = vector.shape_cast %32 : vector<32x1xf32> to vector<1x32x1xf32>
    tpu.vector_store %arg9[%c0_25, %c0_26, %c0_27], %35 {strides = array<i32>} : memref<1x32x1xf32, #tpu.memory_space<vmem>>, vector<1x32x1xf32>,
    %c0_28 = arith.constant 0 : index
    %c0_29 = arith.constant 0 : index
    %36 = vector.load %arg6[%c0_28, %c0_29] : memref<32x1xf32, #tpu.memory_space<vmem>>, vector<32x1xf32>
    %37 = arith.mulf %32, %36 : vector<32x1xf32>
    %c0_30 = arith.constant 0 : index
    %c0_31 = arith.constant 0 : index
    %38 = vector.load %arg5[%c0_30, %c0_31] : memref<32x1xf32, #tpu.memory_space<vmem>>, vector<32x1xf32>
    %39 = arith.mulf %38, %37 : vector<32x1xf32>
    %c0_32 = arith.constant 0 : index
    %c0_33 = arith.constant 0 : index
    %40 = vector.load %arg7[%c0_32, %c0_33] : memref<32x1xf32, #tpu.memory_space<vmem>>, vector<32x1xf32>
    %41 = arith.addf %39, %40 : vector<32x1xf32>
    %c0_34 = arith.constant 0 : index
    %c0_35 = arith.constant 0 : index
    %c0_36 = arith.constant 0 : index
    %42 = vector.load %arg10[%c0_34, %c0_35, %c0_36] : memref<1x32x256xf32, #tpu.memory_space<vmem>>, vector<1x32x256xf32>
    %43 = vector.shape_cast %42 : vector<1x32x256xf32> to vector<32x256xf32>
    %44 = vector.broadcast %37 : vector<32x1xf32> to vector<32x256xf32>
    %45 = arith.mulf %43, %44 : vector<32x256xf32>
    %46 = vector.broadcast %41 : vector<32x1xf32> to vector<32x256xf32>
    %47 = arith.addf %45, %46 : vector<32x256xf32>
    %cst_37 = arith.constant 0.000000e+00 : f32
    %48 = vector.broadcast %cst_37 : f32 to vector<32x256xf32>
    %49 = arith.maximumf %47, %48 : vector<32x256xf32>
    %c0_38 = arith.constant 0 : index
    %c0_39 = arith.constant 0 : index
    %c0_40 = arith.constant 0 : index
    %50 = vector.load %arg8[%c0_38, %c0_39, %c0_40] : memref<1x32x256xf32, #tpu.memory_space<vmem>>, vector<1x32x256xf32>
    %51 = vector.shape_cast %50 : vector<1x32x256xf32> to vector<32x256xf32>
    %52 = vector.shape_cast %49 : vector<32x256xf32> to vector<1x32x256xf32>
    tpu.vector_store %arg8[%c0_38, %c0_39, %c0_40], %52 {strides = array<i32>} : memref<1x32x256xf32, #tpu.memory_space<vmem>>, vector<1x32x256xf32>,
    return
  }
  func.func @transform_0(%arg0: i32) -> (i32, i32, i32) {
    %c0_i32 = arith.constant 0 : i32
    %c0_i32_0 = arith.constant 0 : i32
    %c0_i32_1 = arith.constant 0 : i32
    return %arg0, %c0_i32, %c0_i32_0 : i32, i32, i32
  }
  func.func @transform_1(%arg0: i32) -> (i32, i32) {
    %c0_i32 = arith.constant 0 : i32
    %c0_i32_0 = arith.constant 0 : i32
    %c0_i32_1 = arith.constant 0 : i32
    return %c0_i32, %c0_i32_0 : i32, i32
  }
  func.func @transform_2(%arg0: i32) -> (i32, i32) {
    %c0_i32 = arith.constant 0 : i32
    %c0_i32_0 = arith.constant 0 : i32
    %c0_i32_1 = arith.constant 0 : i32
    return %c0_i32, %c0_i32_0 : i32, i32
  }
  func.func @transform_3(%arg0: i32) -> (i32, i32) {
    %c0_i32 = arith.constant 0 : i32
    %c0_i32_0 = arith.constant 0 : i32
    %c0_i32_1 = arith.constant 0 : i32
    return %c0_i32, %c0_i32_0 : i32, i32
  }
  func.func @transform_4(%arg0: i32) -> (i32, i32) {
    %c0_i32 = arith.constant 0 : i32
    %c0_i32_0 = arith.constant 0 : i32
    %c0_i32_1 = arith.constant 0 : i32
    return %c0_i32, %c0_i32_0 : i32, i32
  }
  func.func @transform_5(%arg0: i32) -> (i32, i32) {
    %c0_i32 = arith.constant 0 : i32
    %c0_i32_0 = arith.constant 0 : i32
    %c0_i32_1 = arith.constant 0 : i32
    return %c0_i32, %c0_i32_0 : i32, i32
  }
  func.func @transform_6(%arg0: i32) -> (i32, i32) {
    %c0_i32 = arith.constant 0 : i32
    %c0_i32_0 = arith.constant 0 : i32
    %c0_i32_1 = arith.constant 0 : i32
    return %c0_i32, %c0_i32_0 : i32, i32
  }
  func.func @transform_7(%arg0: i32) -> (i32, i32, i32) {
    %c0_i32 = arith.constant 0 : i32
    %c0_i32_0 = arith.constant 0 : i32
    %c0_i32_1 = arith.constant 0 : i32
    return %arg0, %c0_i32, %c0_i32_0 : i32, i32, i32
  }
  func.func @transform_8(%arg0: i32) -> (i32, i32, i32) {
    %c0_i32 = arith.constant 0 : i32
    %c0_i32_0 = arith.constant 0 : i32
    %c0_i32_1 = arith.constant 0 : i32
    return %arg0, %c0_i32, %c0_i32_0 : i32, i32, i32
  }
}

</mosaic_0001>

<bundles_post_ra>
// kernel: single_channel_attention_block.1
= control target key start
LH: loop header
LB: loop body
LE: loop exit
PB: predicated region body
PF: predicated region fallthrough
CT: control target
= control target key end

     0   :  { %s1100_s27 = smov 0   ;;  %s1261_s0 = inlined_call_operand.vmem [shape: f32[2,36,256], index: 0, kind: input, shape index: {}]   ;;  %s1262_s1 = inlined_call_operand.vmem [shape: f32[32,36], index: 1, kind: input, shape index: {}]   ;;  %s1263_s2 = inlined_call_operand.vmem [shape: f32[8,32], index: 2, kind: input, shape index: {}]   ;;  %s1264_s3 = inlined_call_operand.vmem [shape: f32[32,8], index: 3, kind: input, shape index: {}]   ;;  %s1265_s4 = inlined_call_operand.vmem [shape: f32[32,1], index: 4, kind: input, shape index: {}]   ;;  %s1266_s5 = inlined_call_operand.vmem [shape: f32[32,1], index: 5, kind: input, shape index: {}]   ;;  %s1267_s6 = inlined_call_operand.vmem [shape: f32[32,1], index: 6, kind: input, shape index: {}]   ;;  %s1268_s7 = inlined_call_operand.vmem [shape: f32[2,32,256], index: 7, kind: output, shape index: {0}]   ;;  %s1269_s8 = inlined_call_operand.vmem [shape: f32[2,32,1], index: 8, kind: output, shape index: {1}]  }
   0x1 LB: > { %s938_s28 = sadd.s32 4294967295, %s1048_s27   ;;  %p942_p0 = scmp.ge.s32.totalorder %s1048_s27, 1  ;;  %s1048_s27 = sphi %s1100_s27, %s19_s27  }
   0x2   : > { %p265_p1 = scmp.lt.s32.totalorder %s1048_s27, 3 }
   0x4   : > { %p266_p2 = pnand %p942_p0, %p265_p1 }
   0x5   : > { %p304_p3 = scmp.lt.s32.totalorder (!%p266_p2), %s938_s28, 1  ;;  %v1050_v0 = vmov (!%p266_p2), 0.0   ;;  %vm346_vm0 = vcmask (!%p266_p2), 1043456   ;;  %v319_v15 = vld [vmem:[%s1262_s1] sm:$0xff] (!%p266_p2)  ;;  %vm333_vm1 = vcmask (!%p266_p2), 293888   ;;  %v320_v16 = vld [vmem:[%s1262_s1 + $0x8] sm:$0xff] (!%p266_p2) }
   0x6   : > { %269 = sbr.rel (%p266_p2) target bundleno = 1193 (0x4a9), region = 48  ;;  %417 = vmatprep.mubr.f32.mxu0 (!%p266_p2), %v1050_v0  ;;  %v321_v17 = vld [vmem:[%s1262_s1 + $0x10] sm:$0xff] (!%p266_p2)  ;;  %v322_v18 = vld [vmem:[%s1262_s1 + $0x18] sm:$0xff] (!%p266_p2)  ;;  %v1051_v19 = vmov (!%p266_p2), 0   ;;  %v1165_v36 = vld [vmem:[%s1265_s4 + $0x8] sm:$0xff] (!%p266_p2)  ;;  %v1052_v39 = vmov (!%p266_p2), 0.0|0.0  }
   0x7   : > { %1025 = vset.pattern.permute.xlu1 (!%p266_p2), %v1051_v19  ;;  %1024 = vset.pattern.permute.xlu0 (!%p266_p2), %v1051_v19  ;;  %v1171_v37 = vld [vmem:[%s1265_s4 + $0x10] sm:$0xff] (!%p266_p2)  ;;  %v1177_v38 = vld [vmem:[%s1265_s4] sm:$0xff] (!%p266_p2)  ;;  %v1183_v40 = vld [vmem:[%s1265_s4 + $0x18] sm:$0xff] (!%p266_p2)  ;;  %vm1053_vm2 = vmmov (!%p266_p2), 0   ;;  %vm466_vm3 = vcmask (!%p266_p2), 7168   ;;  %vm483_vm4 = vcmask (!%p266_p2), 15368  }
   0x8   : > { %1004 = vmatprep.subr.bf16.mxu1 (!%p266_p2), %v1052_v39  ;;  %985 = vmatprep.mubr.msk.f32.mxu1 (!%p266_p2), %vm1053_vm2, %v1050_v0  ;;  %vm521_vm5 = vcmask (!%p266_p2), 261120   ;;  %vm600_vm6 = vcmask (!%p266_p2), 64512   ;;  %s1054_s17 = smov (!%p266_p2), 127  }
   0xd   : > { %s1271_s28 = smov (!%p304_p3, %s938_s28), 1 }
   0xe   : > { %s1010_s29 = smul.u32 80, %s1271_s28  ;;  %s966_s18 = sshll.u32 %s1271_s28, 5 }
   0xf   : > { %s318_s21 = scalar_lea.vmem %s1269_s8, %s966_s18  ;;  %s965_s18 = sshll.u32 %s1271_s28, 6 }
  0x10   : > { %s308_s10 = scalar_lea.vmem %s1261_s0, %s1010_s29 }
  0x11   : > { %v324_v1 = vld [vmem:[%s308_s10 + $0x8] sm:$0xff]  ;;  %v326_v2 = vld [vmem:[%s308_s10 + $0x18] sm:$0xff]  ;;  %v323_v3 = vld [vmem:[%s308_s10] sm:$0xff] }
  0x12   : > { %v996_v4 = vpack.c.bf16 %v326_v2, %v324_v1  ;;  %v325_v5 = vld [vmem:[%s308_s10 + $0x10] sm:$0xff]  ;;  %v328_v6 = vld [vmem:[%s308_s10 + $0x28] sm:$0xff]  ;;  %v330_v7 = vld [vmem:[%s308_s10 + $0x38] sm:$0xff] }
  0x13   : > { %v998_v8 = vpack.c.bf16 %v325_v5, %v323_v3  ;;  %v1000_v9 = vpack.c.bf16 %v330_v7, %v328_v6  ;;  %v327_v10 = vld [vmem:[%s308_s10 + $0x20] sm:$0xff]  ;;  %v329_v11 = vld [vmem:[%s308_s10 + $0x30] sm:$0xff]  ;;  %v332_v13 = vld [vmem:[%s308_s10 + $0x48] sm:$0xf] }
  0x14   : > { %997 = vmatprep.subr.bf16.mxu0 %v996_v4  ;;  %v1002_v12 = vpack.c.bf16 %v329_v11, %v327_v10  ;;  %v331_v14 = vld [vmem:[%s308_s10 + $0x40] sm:$0xf]  ;;  %v599_v10 = vld [vmem:[%s1264_s3 + $0x18] sm:$0xff] }
  0x15   : > { %999 = vmatpush1.bf16.msra.mxu0 %v998_v8  ;;  %v520_v3 = vld [vmem:[%s1263_s2] sm:$0xff]  ;;  %v597_v8 = vld [vmem:[%s1264_s3 + $0x8] sm:$0xff] }
  0x16   : > { %1001 = vmatprep.subr.bf16.mxu0 %v1000_v9  ;;  %v596_v4 = vld [vmem:[%s1264_s3] sm:$0xff]  ;;  %v598_v9 = vld [vmem:[%s1264_s3 + $0x10] sm:$0xff] }
  0x19   : > { %1003 = vmatpush1.bf16.msra.mxu0 %v1002_v12 }
  0x1a   : > { %948 = vmatprep.subr.msk.mxu0 %vm346_vm0, %v332_v13 }
  0x1d   : > { %949 = vmatpush1.msk.msra.mxu0 %vm346_vm0, %v331_v14 }
  0x1e   : > { %950 = vmatmul.mubr.msk.f32.vlgmr.msra.gmra.mrb[0].mxu0 %vm333_vm1, %v319_v15 }
  0x1f   : > { %423 = vmatprep.mubr.f32.mxu0 %v1050_v0 }
  0x22   : > { %951 = vmatmul.mubr.msk.f32.gmra.mrb[2].mxu0 %vm333_vm1, %v320_v16 }
  0x23   : > { %429 = vmatprep.mubr.f32.mxu0 %v1050_v0 }
  0x26   : > { %952 = vmatmul.mubr.msk.f32.gmra.mrb[4].mxu0 %vm333_vm1, %v321_v17 }
  0x27   : > { %435 = vmatprep.mubr.f32.mxu0 %v1050_v0 }
  0x2a   : > { %953 = vmatmul.mubr.msk.f32.gmra.mrb[6].mxu0 %vm333_vm1, %v322_v18 }
  0xf1   : > { %v1130_v20 = vpop.f32.mrb[0].mxu0 }
  0xf2   : > { %v1132_v21 = vpop.f32.mrb[1].mxu0 }
  0xf3   : > { %v471_v22 = vmax.f32 %v1130_v20, %v1132_v21  ;;  %v450_v23 = vadd.f32 %v1132_v21, %v1130_v20 }
  0xf5   : > { %472 = vmax.xlane.f32.xlu1 %v471_v22  ;;  %451 = vadd.xlane.f32.xlu0 %v450_v23  ;;  %v1138_v24 = vpop.f32.mrb[2].mxu0 }
  0xf6   : > { %v1140_v25 = vpop.f32.mrb[3].mxu0 }
  0xf7   : > { %v474_v26 = vmax.f32 %v1138_v24, %v1140_v25  ;;  %v453_v27 = vadd.f32 %v1140_v25, %v1138_v24 }
  0xf9   : > { %475 = vmax.xlane.f32.xlu1 %v474_v26  ;;  %454 = vadd.xlane.f32.xlu0 %v453_v27  ;;  %v1146_v28 = vpop.f32.mrb[4].mxu0 }
  0xfa   : > { %v1148_v29 = vpop.f32.mrb[5].mxu0 }
  0xfb   : > { %v456_v30 = vadd.f32 %v1148_v29, %v1146_v28  ;;  %v477_v31 = vmax.f32 %v1146_v28, %v1148_v29 }
  0xfd   : > { %457 = vadd.xlane.f32.xlu0 %v456_v30  ;;  %v1154_v32 = vpop.f32.mrb[6].mxu0 }
  0xfe   : > { %v1156_v33 = vpop.f32.mrb[7].mxu0 }
  0xff   : > { %v459_v34 = vadd.f32 %v1156_v33, %v1154_v32  ;;  %v480_v35 = vmax.f32 %v1154_v32, %v1156_v33 }
 0x101   : > { %478 = vmax.xlane.f32.xlu0 %v477_v31 }
 0x10a   : > { %503 = vperm.xlu1 %1025, %v1165_v36  }
 0x10e   : > { %508 = vperm.xlu1 %1025, %v1171_v37  }
 0x117   : > { %498 = vperm.xlu0 %1024, %v1177_v38  }
 0x132   : > { %460 = vadd.xlane.f32.xlu1 %v459_v34 }
 0x136   : > { %481 = vmax.xlane.f32.xlu1 %v480_v35 }
 0x147   : > { %513 = vperm.xlu1 %1025, %v1183_v40  }
 0x182   : > { %v452_v41 = vpop.xlane.xlu0 %451  ;;  %v473_v42 = vpop.xlane.xlu1 %472 }
 0x183   : > { %v462_v43 = vmul.f32 0.00390625, %v452_v41 }
 0x185   : > { %467 = vst.msk [vmem:[#allocation3] sm:$0xff] %vm466_vm3, %v462_v43 }
 0x186   : > { %484 = vst.msk [vmem:[#allocation3] sm:$0xff] %vm483_vm4, %v473_v42  ;;  %v455_v44 = vpop.xlane.xlu0 %454  ;;  %v476_v46 = vpop.xlane.xlu1 %475 }
 0x187   : > { %v463_v45 = vmul.f32 0.00390625, %v455_v44 }
 0x189   : > { %468 = vst.msk [vmem:[#allocation3 + $0x8] sm:$0xff] %vm466_vm3, %v463_v45  ;;  %v747_v45 = vld [vmem:[%s1266_s5 + $0x8] sm:$0xff] }
 0x18a   : > { %485 = vst.msk [vmem:[#allocation3 + $0x8] sm:$0xff] %vm483_vm4, %v476_v46  ;;  %v458_v47 = vpop.xlane.xlu0 %457  ;;  %v504_v51 = vpop.permute.xlu1 %503 }
 0x18b   : > { %v464_v48 = vmul.f32 0.00390625, %v458_v47 }
 0x18d   : > { %469 = vst.msk [vmem:[#allocation3 + $0x10] sm:$0xff] %vm466_vm3, %v464_v48  ;;  %v488_v52 = vld [vmem:[#allocation3] sm:$0xff] }
 0x18e   : > { %v479_v49 = vpop.xlane.xlu0 %478  ;;  %v509_v57 = vpop.permute.xlu1 %508 }
 0x18f   : > { %486 = vst.msk [vmem:[#allocation3 + $0x10] sm:$0xff] %vm483_vm4, %v479_v49 }
 0x191   : > { %v489_v50 = vld [vmem:[#allocation3 + $0x8] sm:$0xff] }
 0x192   : > { %v517_v54 = vadd.f32 %v504_v51, %v489_v50  ;;  %v746_v50 = vld [vmem:[%s1266_s5] sm:$0xff] }
 0x196   : > { %v499_v53 = vpop.permute.xlu0 %498  ;;  %v490_v61 = vld [vmem:[#allocation3 + $0x10] sm:$0xff] }
 0x197   : > { %v516_v55 = vadd.f32 %v499_v53, %v488_v52  ;;  %v518_v0 = vadd.f32 %v509_v57, %v490_v61  ;;  %v748_v53 = vld [vmem:[%s1266_s5 + $0x10] sm:$0xff]  ;;  %v762_v57 = vld [vmem:[%s1267_s6] sm:$0xff] }
 0x199   : > { %v1005_v56 = vpack.c.bf16 %v517_v54, %v516_v55 }
 0x19b   : > { %1006 = vmatpush3.bf16.msra.mxu1 %v1005_v56 }
 0x19c   : > { %1007 = vmatprep.subr.bf16.mxu1 %v1052_v39 }
 0x1bf   : > { %v461_v58 = vpop.xlane.xlu1 %460 }
 0x1c0   : > { %v465_v59 = vmul.f32 0.00390625, %v461_v58  ;;  %v749_v58 = vld [vmem:[%s1266_s5 + $0x18] sm:$0xff] }
 0x1c2   : > { %470 = vst.msk [vmem:[#allocation3 + $0x18] sm:$0xff] %vm466_vm3, %v465_v59 }
 0x1c3   : > { %v482_v60 = vpop.xlane.xlu1 %481 }
 0x1c4   : > { %487 = vst.msk [vmem:[#allocation3 + $0x18] sm:$0xff] %vm483_vm4, %v482_v60 }
 0x1c7   : > { %v514_v63 = vpop.permute.xlu1 %513 }
 0x1cb   : > { %v491_v62 = vld [vmem:[#allocation3 + $0x18] sm:$0xff] }
 0x1cc   : > { %v519_v1 = vadd.f32 %v514_v63, %v491_v62 }
 0x1ce   : > { %v1008_v2 = vpack.c.bf16 %v519_v1, %v518_v0  ;;  %v763_v0 = vld [vmem:[%s1267_s6 + $0x8] sm:$0xff] }
 0x1d0   : > { %1009 = vmatpush3.bf16.msra.mxu1 %v1008_v2 }
 0x1d3   : > { %986 = vmatmul.mubr.msk.f32.vlgmr.msra.gmra.mrb[0].mxu1 %vm521_vm5, %v520_v3 }
 0x1d4   : > { %990 = vmatprep.mubr.msk.f32.mxu1 %vm600_vm6, %v596_v4 }
 0x2a6   : > { %v591_v5 = vpop.f32.mrb[0].mxu1 }
 0x2a7   : > { %v595_v6 = vmax.f32 %v591_v5, 0.0  ;;  %v987_v7 = vpop.f32.mrb[1].mxu1 }
 0x2a9   : > { %988 = vmatprep.subr.mxu1 %v595_v6 }
 0x2aa   : > { %989 = vmatpush3.msra.mxu1 %v595_v6 }
 0x2ab   : > { %991 = vmatmul.mubr.msk.f32.vlgmr.msra.gmra.mrb[2].mxu1 %vm600_vm6, %v597_v8 }
 0x2ac   : > { %993 = vmatprep.mubr.msk.f32.mxu1 %vm600_vm6, %v598_v9 }
 0x2af   : > { %994 = vmatmul.mubr.msk.f32.gmra.mrb[4].mxu1 %vm600_vm6, %v599_v10 }
 0x37e   : > { %v992_v11 = vpop.f32.mrb[2].mxu1 }
 0x37f   : > { %704 = vrot.lane.b32.xlu1 %v992_v11, %s1054_s17  ;;  %v679_v12 = vpop.f32.mrb[3].mxu1 }
 0x382   : > { %v995_v13 = vpop.f32.mrb[4].mxu1 }
 0x383   : > { %702 = vrot.lane.b32.xlu1 %v679_v12, %s1054_s17  ;;  %v689_v14 = vpop.f32.mrb[5].mxu1 }
 0x387   : > { %706 = vrot.lane.b32.xlu1 %v689_v14, %s1054_s17 }
 0x38b   : > { %708 = vrot.lane.b32.xlu1 %v995_v13, %s1054_s17 }
 0x3f1   : > { %v705_v15 = vpop.permute.xlu1 %704 }
 0x3f2   : > { %v715_v16 = vadd.f32 %v992_v11, %v705_v15 }
 0x3f4   : > { %v960_v17 = vmul.f32 -1.442695, %v715_v16 }
 0x3f5   : > { %v703_v18 = vpop.permute.xlu1 %702 }
 0x3f6   : > { %1026 = vpow2.f32 %v960_v17  ;;  %v714_v19 = vadd.f32 %v703_v18, %v679_v12 }
 0x3f8   : > { %v959_v22 = vmul.f32 -1.442695, %v714_v19 }
 0x3f9   : > { %v707_v23 = vpop.permute.xlu1 %706 }
 0x3fa   : > { %1028 = vpow2.f32 %v959_v22  ;;  %v716_v26 = vadd.f32 %v707_v23, %v689_v14 }
 0x3fc   : > { %v961_v27 = vmul.f32 -1.442695, %v716_v26 }
 0x3fd   : > { %v709_v30 = vpop.permute.xlu1 %708 }
 0x3fe   : > { %1030 = vpow2.f32 %v961_v27  ;;  %v717_v31 = vadd.f32 %v995_v13, %v709_v30 }
 0x400   : > { %v1027_v34 = vpop.eup %1026  ;;  %v962_v35 = vmul.f32 -1.442695, %v717_v31 }
 0x401   : > { %v731_v39 = vadd.f32 1.0, %v1027_v34 }
 0x402   : > { %1032 = vpow2.f32 %v962_v35 }
 0x403   : > { %1034 = vrcp.f32 %v731_v39 }
 0x404   : > { %v1029_v41 = vpop.eup %1028 }
 0x405   : > { %v730_v42 = vadd.f32 1.0, %v1029_v41 }
 0x407   : > { %1036 = vrcp.f32 %v730_v42 }
 0x408   : > { %v1031_v43 = vpop.eup %1030 }
 0x409   : > { %v732_v44 = vadd.f32 1.0, %v1031_v43 }
 0x40b   : > { %1038 = vrcp.f32 %v732_v44 }
 0x40c   : > { %v1033_v46 = vpop.eup %1032 }
 0x40d   : > { %v1035_v47 = vpop.eup %1034  ;;  %v733_v48 = vadd.f32 1.0, %v1033_v46 }
 0x40e   : > { %743 = vst.msk [vmem:[%s318_s21 + $0x8] sm:$0xff] %vm466_vm3, %v1035_v47  ;;  %v751_v49 = vmul.f32 %v1035_v47, %v747_v45 }
 0x40f   : > { %1040 = vrcp.f32 %v733_v48 }
 0x410   : > { %785 = vperm.xlu0 %1024, %v751_v49   ;;  %v759_v63 = vmul.f32 %v751_v49, %v1165_v36 }
 0x411   : > { %v1037_v51 = vpop.eup %1036 }
 0x412   : > { %742 = vst.msk [vmem:[%s318_s21] sm:$0xff] %vm466_vm3, %v1037_v51  ;;  %v750_v52 = vmul.f32 %v1037_v51, %v746_v50  ;;  %v767_v2 = vadd.f32 %v763_v0, %v759_v63 }
 0x414   : > { %780 = vperm.xlu1 %1025, %v750_v52   ;;  %v758_v56 = vmul.f32 %v750_v52, %v1177_v38  ;;  %v764_v38 = vld [vmem:[%s1267_s6 + $0x10] sm:$0xff] }
 0x415   : > { %v1039_v54 = vpop.eup %1038 }
 0x416   : > { %744 = vst.msk [vmem:[%s318_s21 + $0x10] sm:$0xff] %vm466_vm3, %v1039_v54  ;;  %v752_v55 = vmul.f32 %v1039_v54, %v748_v53  ;;  %v766_v60 = vadd.f32 %v762_v57, %v758_v56 }
 0x418   : > { %790 = vperm.xlu1 %1025, %v752_v55   ;;  %v760_v62 = vmul.f32 %v752_v55, %v1171_v37  ;;  %v765_v37 = vld [vmem:[%s1267_s6 + $0x18] sm:$0xff] }
 0x419   : > { %v1041_v59 = vpop.eup %1040 }
 0x41a   : > { %745 = vst.msk [vmem:[%s318_s21 + $0x18] sm:$0xff] %vm466_vm3, %v1041_v59  ;;  %v753_v61 = vmul.f32 %v1041_v59, %v749_v58  ;;  %v768_v1 = vadd.f32 %v764_v38, %v760_v62  ;;  %s313_s21 = scalar_lea.vmem %s1268_s7, %s965_s18 }
 0x41c   : > { %808 = vperm.xlu1 %1025, %v766_v60   ;;  %795 = vperm.xlu0 %1024, %v753_v61   ;;  %v761_v3 = vmul.f32 %v753_v61, %v1183_v40 }
 0x41e   : > { %v769_v36 = vadd.f32 %v765_v37, %v761_v3 }
 0x420   : > { %818 = vperm.xlu1 %1025, %v768_v1   ;;  %813 = vperm.xlu0 %1024, %v767_v2  }
 0x424   : > { %823 = vperm.xlu0 %1024, %v769_v36  }
 0x48f   : > { %v786_v5 = vpop.permute.xlu0 %785 }
 0x490   : > { %v800_v12 = vmul.f32 %v786_v5, %v1138_v24  ;;  %v801_v13 = vmul.f32 %v786_v5, %v1140_v25 }
 0x493   : > { %v781_v4 = vpop.permute.xlu1 %780 }
 0x494   : > { %v798_v7 = vmul.f32 %v781_v4, %v1130_v20  ;;  %v799_v8 = vmul.f32 %v781_v4, %v1132_v21 }
 0x497   : > { %v791_v6 = vpop.permute.xlu1 %790 }
 0x498   : > { %v802_v14 = vmul.f32 %v791_v6, %v1146_v28  ;;  %v803_v15 = vmul.f32 %v791_v6, %v1148_v29 }
 0x49b   : > { %v796_v9 = vpop.permute.xlu0 %795  ;;  %v809_v10 = vpop.permute.xlu1 %808 }
 0x49c   : > { %v826_v11 = vadd.f32 %v809_v10, %v798_v7  ;;  %v827_v40 = vadd.f32 %v809_v10, %v799_v8  ;;  %v804_v25 = vmul.f32 %v796_v9, %v1154_v32  ;;  %v805_v23 = vmul.f32 %v796_v9, %v1156_v33 }
 0x49e   : > { %v834_v20 = vmax.f32 %v826_v11, 0.0  ;;  %v835_v16 = vmax.f32 %v827_v40, 0.0 }
 0x49f   : > { %v814_v21 = vpop.permute.xlu0 %813  ;;  %v819_v17 = vpop.permute.xlu1 %818 }
 0x4a0   : > { %842 = vst [vmem:[%s313_s21] sm:$0xff] %v834_v20  ;;  %843 = vst [vmem:[%s313_s21 + $0x8] sm:$0xff] %v835_v16  ;;  %v828_v18 = vadd.f32 %v814_v21, %v800_v12  ;;  %v829_v19 = vadd.f32 %v814_v21, %v801_v13  ;;  %v830_v22 = vadd.f32 %v819_v17, %v802_v14 }
 0x4a1   : > { %v831_v24 = vadd.f32 %v819_v17, %v803_v15 }
 0x4a2   : > { %v836_v26 = vmax.f32 %v828_v18, 0.0  ;;  %v837_v27 = vmax.f32 %v829_v19, 0.0  ;;  %v838_v30 = vmax.f32 %v830_v22, 0.0 }
 0x4a3   : > { %v839_v28 = vmax.f32 %v831_v24, 0.0  ;;  %v824_v31 = vpop.permute.xlu0 %823 }
 0x4a4   : > { %844 = vst [vmem:[%s313_s21 + $0x10] sm:$0xff] %v836_v26  ;;  %845 = vst [vmem:[%s313_s21 + $0x18] sm:$0xff] %v837_v27  ;;  %v832_v29 = vadd.f32 %v824_v31, %v804_v25  ;;  %v833_v34 = vadd.f32 %v824_v31, %v805_v23 }
 0x4a5   : > { %846 = vst [vmem:[%s313_s21 + $0x20] sm:$0xff] %v838_v30  ;;  %847 = vst [vmem:[%s313_s21 + $0x28] sm:$0xff] %v839_v28 }
 0x4a6   : > { %v840_v35 = vmax.f32 %v832_v29, 0.0  ;;  %v841_v39 = vmax.f32 %v833_v34, 0.0 }
 0x4a8   : > { %848 = vst [vmem:[%s313_s21 + $0x30] sm:$0xff] %v840_v35  ;;  %849 = vst [vmem:[%s313_s21 + $0x38] sm:$0xff] %v841_v39 }
 0x4a9 PF: > { %s19_s27 = sadd.s32 1, %s1048_s27  }
 0x4aa   : > { %p16_p4 = scmp.ge.s32.totalorder %s19_s27, 4  }
 0x4ac   :  { %18 = sbr.rel (!%p16_p4) target bundleno = 1 (0x1), region = 90 }

</bundles_post_ra>
